<compile_context>
chip_gen: v7x
topology: tpu7x:2x2x1
jax: 0.10.0
libtpu: 0.0.40
codegen_flags: <defaults>
</compile_context>

<pallas_src>
import functools

import jax
import jax.numpy as jnp
from jax.experimental import pallas as pl
from jax.experimental.pallas import tpu as pltpu


def _round_up(x, m):
    return (x + m - 1) // m * m


@functools.lru_cache(maxsize=1)
def _vmem_limit_bytes():
    """~75% of physical VMEM: 48 MiB on v7x (64 MiB), 96 MiB on v5e/v6e (128 MiB)."""
    try:
        cap = int(pltpu.get_tpu_info().vmem_capacity_bytes)
    except Exception:
        cap = 64 * 1024 * 1024  # conservative (v7x) fallback
    return int(min(cap * 3 // 4, 112 * 1024 * 1024))


def _choose_row_tile(m_padded):
    """Row (M) tile: multiple-of-128 divisor of m_padded, <= 512, and leaving
    >= 2 row blocks when possible (v7x has 2 TensorCores)."""
    if m_padded <= 256:
        return min(m_padded, 128)
    t = min(512, (m_padded // 2) // 128 * 128)
    while t > 128 and m_padded % t:
        t -= 128
    return t


# ---------------------------------------------------------------------------
# Gridded path: generic row-streaming matmul with resident B and fused epilogue
# ---------------------------------------------------------------------------
def _row_matmul_kernel(*refs, apply_relu, has_bias, has_next, tk):
    """One (tm, Nout) output row-tile of  A @ B (+bias)(+relu)(@W_next).

    A is streamed (tm, tk) per k step; B (K, Nmid), bias (1, Nmid) and
    W_next (Nmid, Nout) are VMEM-resident full blocks.
    """
    it = iter(refs)
    a_ref = next(it)
    b_ref = next(it)
    bias_ref = next(it) if has_bias else None
    w_next_ref = next(it) if has_next else None
    o_ref = next(it)
    acc_ref = next(it)

    kk = pl.program_id(1)

    @pl.when(kk == 0)
    def _init():
        acc_ref[...] = jnp.zeros_like(acc_ref)

    k0 = pl.multiple_of(kk * tk, 128)
    acc_ref[...] += jnp.dot(a_ref[...], b_ref[pl.ds(k0, tk), :],
                            preferred_element_type=jnp.float32)

    @pl.when(kk == pl.num_programs(1) - 1)
    def _finalize():
        r = acc_ref[...]
        if has_bias:
            r = r + bias_ref[...]                 # (tm,Nmid) + (1,Nmid)
        if apply_relu:
            r = jnp.maximum(r, 0.0)
        if has_next:                              # fused next feature transform
            r = jnp.dot(r.astype(w_next_ref.dtype), w_next_ref[...],
                        preferred_element_type=jnp.float32)
        o_ref[...] = r.astype(o_ref.dtype)


def _row_matmul(a, b, *, bias=None, apply_relu=False, w_next=None,
                out_dtype, tm, a_tile_budget_bytes=16 * 1024 * 1024):
    """out = (a @ b (+bias)(+relu)) (@ w_next).  a:(M,K); b:(K,Nmid) stays
    VMEM-resident; dims are multiples of 128 and M % tm == 0."""
    m, k = a.shape
    k2, n_mid = b.shape
    assert k == k2 and m % tm == 0 and k % 128 == 0
    n_out = w_next.shape[1] if w_next is not None else n_mid
    if bias is not None:
        assert bias.shape == (1, n_mid)

    # K tiling for the streamed A operand (B is resident regardless).
    # Prefer tk = K (single k step); cap the double-buffered A tile footprint.
    max_tk = max(128, (a_tile_budget_bytes // (2 * 2 * tm)) // 128 * 128)
    tk = k
    if tk > max_tk:
        tk = max_tk
        while k % tk:           # largest multiple-of-128 divisor of K that fits
            tk -= 128
    k_steps = k // tk
    grid = (m // tm, k_steps)

    in_specs = [pl.BlockSpec((tm, tk), lambda i, kk: (i, kk)),
                pl.BlockSpec((k, n_mid), lambda i, kk: (0, 0))]   # resident B
    operands = [a, b]
    if bias is not None:
        in_specs.append(pl.BlockSpec((1, n_mid), lambda i, kk: (0, 0)))
        operands.append(bias)
    if w_next is not None:
        in_specs.append(pl.BlockSpec((n_mid, n_out), lambda i, kk: (0, 0)))
        operands.append(w_next)

    flops = 2 * m * k * n_mid + (2 * m * n_mid * n_out if w_next is not None else 0)
    bytes_accessed = (a.size * a.dtype.itemsize + b.size * b.dtype.itemsize
                      + (bias.size * bias.dtype.itemsize if bias is not None else 0)
                      + (w_next.size * w_next.dtype.itemsize if w_next is not None else 0)
                      + m * n_out * jnp.dtype(out_dtype).itemsize)

    kernel = functools.partial(_row_matmul_kernel, apply_relu=apply_relu,
                               has_bias=bias is not None,
                               has_next=w_next is not None, tk=tk)
    return pl.pallas_call(
        kernel,
        out_shape=jax.ShapeDtypeStruct((m, n_out), out_dtype),
        grid_spec=pltpu.PrefetchScalarGridSpec(
            num_scalar_prefetch=0,
            grid=grid,
            in_specs=in_specs,
            out_specs=pl.BlockSpec((tm, n_out), lambda i, kk: (i, 0)),
            scratch_shapes=[pltpu.VMEM((tm, n_mid), jnp.float32)],
        ),
        compiler_params=pltpu.CompilerParams(
            dimension_semantics=("parallel", "arbitrary"),
            vmem_limit_bytes=_vmem_limit_bytes(),
        ),
        cost_estimate=pl.CostEstimate(flops=flops, transcendentals=0,
                                      bytes_accessed=bytes_accessed),
    )(*operands)


# ---------------------------------------------------------------------------
# Small-graph path: whole two-layer forward in one un-gridded kernel
# ---------------------------------------------------------------------------
def _fused_small_kernel(a_ref, x_ref, w1_ref, b1_ref, w2_ref, b2_ref, o_ref):
    cd = a_ref.dtype
    xw1 = jnp.dot(x_ref[...], w1_ref[...], preferred_element_type=jnp.float32)
    h1 = jnp.dot(a_ref[...], xw1.astype(cd), preferred_element_type=jnp.float32)
    h1 = jnp.maximum(h1 + b1_ref[...], 0.0)
    xw2 = jnp.dot(h1.astype(cd), w2_ref[...], preferred_element_type=jnp.float32)
    out = jnp.dot(a_ref[...], xw2.astype(cd), preferred_element_type=jnp.float32)
    o_ref[...] = (out + b2_ref[...]).astype(o_ref.dtype)


def _fused_small(a_p, x_p, w1_p, b1_p, w2_p, b2_p):
    n_p = a_p.shape[0]
    in_p, hid_p = w1_p.shape
    out_p = w2_p.shape[1]
    flops = 2 * n_p * (in_p * hid_p + n_p * hid_p + hid_p * out_p + n_p * out_p)
    bytes_accessed = (sum(v.size * v.dtype.itemsize
                          for v in (a_p, x_p, w1_p, b1_p, w2_p, b2_p))
                      + n_p * out_p * 4)
    return pl.pallas_call(
        _fused_small_kernel,
        out_shape=jax.ShapeDtypeStruct((n_p, out_p), jnp.float32),
        compiler_params=pltpu.CompilerParams(
            vmem_limit_bytes=_vmem_limit_bytes()),
        cost_estimate=pl.CostEstimate(flops=flops, transcendentals=0,
                                      bytes_accessed=bytes_accessed),
    )(a_p, x_p, w1_p, b1_p, w2_p, b2_p)


def _fused_small_vmem_bytes(n_p, in_p, hid_p, out_p):
    bf, f32 = 2, 4
    return (n_p * n_p * bf + n_p * in_p * bf
            + in_p * hid_p * bf + hid_p * f32
            + hid_p * out_p * bf + out_p * f32
            + n_p * out_p * f32
            + n_p * hid_p * f32 * 2 + n_p * out_p * f32)   # intermediates


# ---------------------------------------------------------------------------
# Plain-JAX glue
# ---------------------------------------------------------------------------
def build_normalized_adjacency(edge_index, num_nodes):
    """Dense A_hat = D^{-1/2}(A + I)D^{-1/2} with A[dst, src] = 1.

    Matches PyG gcn_norm(add_self_loops=True); duplicate edges accumulate.
    """
    src, dst = edge_index[0], edge_index[1]
    a = jnp.zeros((num_nodes, num_nodes), jnp.float32)
    a = a.at[dst, src].add(1.0)                     # message j -> i lands in row i
    a = a + jnp.eye(num_nodes, dtype=jnp.float32)   # self loops => deg >= 1
    d_inv_sqrt = jax.lax.rsqrt(a.sum(axis=1))
    return d_inv_sqrt[:, None] * a * d_inv_sqrt[None, :]


def _pad2(x, rows, cols, dtype):
    out = jnp.zeros((rows, cols), dtype)
    return out.at[: x.shape[0], : x.shape[1]].set(x.astype(dtype))


def gcn_encoder(x, edge_index, w1, b1, w2, b2, *,
                compute_dtype=jnp.bfloat16, force_gridded=False):
    n, in_ch = x.shape
    hid = w1.shape[1]
    out_ch = w2.shape[1]

    # Pad node and feature dims to lane-dense multiples of 128.
    n_p = _round_up(n, 128)
    in_p = _round_up(in_ch, 128)
    hid_p = _round_up(hid, 128)
    out_p = _round_up(out_ch, 128)

    a_hat = build_normalized_adjacency(edge_index, n)

    a_p = _pad2(a_hat, n_p, n_p, compute_dtype)
    x_p = _pad2(x, n_p, in_p, compute_dtype)
    w1_p = _pad2(w1, in_p, hid_p, compute_dtype)
    w2_p = _pad2(w2, hid_p, out_p, compute_dtype)
    b1_p = _pad2(b1.reshape(1, -1), 1, hid_p, jnp.float32)
    b2_p = _pad2(b2.reshape(1, -1), 1, out_p, jnp.float32)

    small_budget = min(18 * 1024 * 1024, _vmem_limit_bytes() // 3)
    if (not force_gridded
            and _fused_small_vmem_bytes(n_p, in_p, hid_p, out_p) <= small_budget):
        # Everything (incl. A_hat) fits in VMEM: one fused kernel, A read once.
        out = _fused_small(a_p, x_p, w1_p, b1_p, w2_p, b2_p)
    else:
        tm = _choose_row_tile(n_p)
        # Feature transform (no bias): XW1 = X @ W1, W1 VMEM-resident.
        xw1 = _row_matmul(x_p, w1_p, out_dtype=compute_dtype, tm=tm)
        # Layer-1 aggregation + bias + ReLU, with layer-2's feature transform
        # fused into the epilogue (W2 resident): XW2 = relu(A @ XW1 + b1) @ W2.
        xw2 = _row_matmul(a_p, xw1, bias=b1_p, apply_relu=True, w_next=w2_p,
                          out_dtype=compute_dtype, tm=tm)
        # Layer-2 aggregation + bias: out = A @ XW2 + b2.
        out = _row_matmul(a_p, xw2, bias=b2_p, out_dtype=jnp.float32, tm=tm)

    return out[:n, :out_ch]


def _glorot(key, fan_in, fan_out):
    limit = jnp.sqrt(6.0 / (fan_in + fan_out))
    return jax.random.uniform(key, (fan_in, fan_out), jnp.float32, -limit, limit)


def _reference(x, edge_index, w1, b1, w2, b2):
    a_hat = build_normalized_adjacency(edge_index, x.shape[0])
    h1 = jnp.maximum(a_hat @ (x @ w1) + b1, 0.0)
    return a_hat @ (h1 @ w2) + b2


if __name__ == "__main__":
    key = jax.random.PRNGKey(0)
    kx, ke, k1, k2, kx2, ke2, k3, k4 = jax.random.split(key, 8)

    run = jax.jit(gcn_encoder, static_argnames=("force_gridded",))

    # ---- Test 1: tiny graph (exercises the fused single-kernel path) ----
    N, IN_CH, OUT_CH = 16, 16, 8
    HID = 2 * OUT_CH
    x = jax.random.normal(kx, (N, IN_CH), jnp.float32)
    edge_index = jax.random.randint(ke, (2, 40), 0, N, dtype=jnp.int32)
    w1 = _glorot(k1, IN_CH, HID)
    b1 = jnp.zeros((HID,), jnp.float32)
    w2 = _glorot(k2, HID, OUT_CH)
    b2 = jnp.zeros((OUT_CH,), jnp.float32)

    out = run(x, edge_index, w1, b1, w2, b2)
    jax.block_until_ready(out)
    ref = _reference(x, edge_index, w1, b1, w2, b2)
    assert out.shape == (N, OUT_CH)
    assert jnp.allclose(out, ref, atol=5e-2, rtol=5e-2), float(
        jnp.max(jnp.abs(out - ref)))

    # ---- Test 2: larger graph, force the gridded streaming path ----
    N2, IN2, OUT2 = 200, 32, 8
    HID2 = 2 * OUT2
    x2 = jax.random.normal(kx2, (N2, IN2), jnp.float32)
    edge_index2 = jax.random.randint(ke2, (2, 800), 0, N2, dtype=jnp.int32)
    w1b = _glorot(k3, IN2, HID2)
    b1b = jnp.full((HID2,), 0.1, jnp.float32)
    w2b = _glorot(k4, HID2, OUT2)
    b2b = jnp.full((OUT2,), -0.05, jnp.float32)

    out2 = run(x2, edge_index2, w1b, b1b, w2b, b2b, force_gridded=True)
    jax.block_until_ready(out2)
    ref2 = _reference(x2, edge_index2, w1b, b1b, w2b, b2b)
    assert out2.shape == (N2, OUT2)
    assert jnp.allclose(out2, ref2, atol=1e-1, rtol=1e-1), float(
        jnp.max(jnp.abs(out2 - ref2)))

    print("KERNEL_OK")
</pallas_src>

<mosaic_0001>
module attributes {stable_mosaic.version = 11 : i64} {
  func.func @_fused_small_kernel(%arg0: memref<128x128xbf16, #tpu.memory_space<vmem>>, %arg1: memref<128x128xbf16, #tpu.memory_space<vmem>>, %arg2: memref<128x128xbf16, #tpu.memory_space<vmem>>, %arg3: memref<1x128xf32, #tpu.memory_space<vmem>>, %arg4: memref<128x128xbf16, #tpu.memory_space<vmem>>, %arg5: memref<1x128xf32, #tpu.memory_space<vmem>>, %arg6: memref<128x128xf32, #tpu.memory_space<vmem>>) attributes {dimension_semantics = [], scalar_prefetch = 0 : i64, scratch_operands = 0 : i64, tpu.core_type = #tpu.core_type<tc>} {
    %c0 = arith.constant 0 : index
    %c0_0 = arith.constant 0 : index
    %0 = vector.load %arg1[%c0, %c0_0] : memref<128x128xbf16, #tpu.memory_space<vmem>>, vector<128x128xbf16>
    %c0_1 = arith.constant 0 : index
    %c0_2 = arith.constant 0 : index
    %1 = vector.load %arg2[%c0_1, %c0_2] : memref<128x128xbf16, #tpu.memory_space<vmem>>, vector<128x128xbf16>
    %cst = arith.constant dense<0.000000e+00> : vector<128x128xf32>
    %2 = tpu.matmul %0, %1, %cst {dimension_numbers = #tpu.dot_dimension_numbers<[1], [0], [0], [1], [0, 0, 1, 1], [], []>} : vector<128x128xbf16>, vector<128x128xbf16>, vector<128x128xf32> -> vector<128x128xf32>
    %c0_3 = arith.constant 0 : index
    %c0_4 = arith.constant 0 : index
    %3 = vector.load %arg0[%c0_3, %c0_4] : memref<128x128xbf16, #tpu.memory_space<vmem>>, vector<128x128xbf16>
    %4 = arith.truncf %2 : vector<128x128xf32> to vector<128x128xbf16>
    %cst_5 = arith.constant dense<0.000000e+00> : vector<128x128xf32>
    %5 = tpu.matmul %3, %4, %cst_5 {dimension_numbers = #tpu.dot_dimension_numbers<[1], [0], [0], [1], [0, 0, 1, 1], [], []>} : vector<128x128xbf16>, vector<128x128xbf16>, vector<128x128xf32> -> vector<128x128xf32>
    %c0_6 = arith.constant 0 : index
    %c0_7 = arith.constant 0 : index
    %6 = vector.load %arg3[%c0_6, %c0_7] : memref<1x128xf32, #tpu.memory_space<vmem>>, vector<1x128xf32>
    %7 = vector.broadcast %6 : vector<1x128xf32> to vector<128x128xf32>
    %8 = arith.addf %5, %7 : vector<128x128xf32>
    %cst_8 = arith.constant 0.000000e+00 : f32
    %9 = vector.broadcast %cst_8 : f32 to vector<128x128xf32>
    %10 = arith.maximumf %8, %9 : vector<128x128xf32>
    %11 = arith.truncf %10 : vector<128x128xf32> to vector<128x128xbf16>
    %c0_9 = arith.constant 0 : index
    %c0_10 = arith.constant 0 : index
    %12 = vector.load %arg4[%c0_9, %c0_10] : memref<128x128xbf16, #tpu.memory_space<vmem>>, vector<128x128xbf16>
    %cst_11 = arith.constant dense<0.000000e+00> : vector<128x128xf32>
    %13 = tpu.matmul %11, %12, %cst_11 {dimension_numbers = #tpu.dot_dimension_numbers<[1], [0], [0], [1], [0, 0, 1, 1], [], []>} : vector<128x128xbf16>, vector<128x128xbf16>, vector<128x128xf32> -> vector<128x128xf32>
    %c0_12 = arith.constant 0 : index
    %c0_13 = arith.constant 0 : index
    %14 = vector.load %arg0[%c0_12, %c0_13] : memref<128x128xbf16, #tpu.memory_space<vmem>>, vector<128x128xbf16>
    %15 = arith.truncf %13 : vector<128x128xf32> to vector<128x128xbf16>
    %cst_14 = arith.constant dense<0.000000e+00> : vector<128x128xf32>
    %16 = tpu.matmul %14, %15, %cst_14 {dimension_numbers = #tpu.dot_dimension_numbers<[1], [0], [0], [1], [0, 0, 1, 1], [], []>} : vector<128x128xbf16>, vector<128x128xbf16>, vector<128x128xf32> -> vector<128x128xf32>
    %c0_15 = arith.constant 0 : index
    %c0_16 = arith.constant 0 : index
    %17 = vector.load %arg5[%c0_15, %c0_16] : memref<1x128xf32, #tpu.memory_space<vmem>>, vector<1x128xf32>
    %18 = vector.broadcast %17 : vector<1x128xf32> to vector<128x128xf32>
    %19 = arith.addf %16, %18 : vector<128x128xf32>
    %c0_17 = arith.constant 0 : index
    %c0_18 = arith.constant 0 : index
    %20 = vector.load %arg6[%c0_17, %c0_18] : memref<128x128xf32, #tpu.memory_space<vmem>>, vector<128x128xf32>
    tpu.vector_store %arg6[%c0_17, %c0_18], %19 {strides = array<i32>} : memref<128x128xf32, #tpu.memory_space<vmem>>, vector<128x128xf32>,
    return
  }
}

</mosaic_0001>

<bundles_post_ra>
// kernel: gcn_encoder.1
= control target key start
LH: loop header
LB: loop body
LE: loop exit
PB: predicated region body
PF: predicated region fallthrough
CT: control target
= control target key end

     0   :  { %s1217_s2 = inlined_call_operand.vmem [shape: bf16[128,128], index: 2, kind: input, shape index: {}]   ;;  %s1218_s1 = inlined_call_operand.vmem [shape: bf16[128,128], index: 1, kind: input, shape index: {}]   ;;  %s1219_s0 = inlined_call_operand.vmem [shape: bf16[128,128], index: 0, kind: input, shape index: {}]   ;;  %s1220_s4 = inlined_call_operand.vmem [shape: bf16[128,128], index: 4, kind: input, shape index: {}]   ;;  %s1221_s3 = inlined_call_operand.vmem [shape: f32[1,128], index: 3, kind: input, shape index: {}]   ;;  %s1222_s5 = inlined_call_operand.vmem [shape: f32[1,128], index: 5, kind: input, shape index: {}]   ;;  %s1223_s6 = inlined_call_operand.vmem [shape: f32[128,128], index: 6, kind: output, shape index: {}]  }
   0x1   :  { %v968_v0 = vld [vmem:[%s1217_s2] sm:$0xff]   ;;  %v969_v1 = vld [vmem:[%s1217_s2 + $0x8] sm:$0xff]   ;;  %v970_v2 = vld [vmem:[%s1217_s2 + $0x10] sm:$0xff]  }
   0x2   :  { %840 = vmatprep.subr.bf16.mxu0 %v968_v0  ;;  %v971_v3 = vld [vmem:[%s1217_s2 + $0x18] sm:$0xff]   ;;  %v976_v4 = vld [vmem:[%s1218_s1] sm:$0xff]   ;;  %v973_v6 = vld [vmem:[%s1217_s2 + $0x28] sm:$0xff]  }
   0x3   :  { %841 = vmatpush3.bf16.msra.mxu0 %v968_v0  ;;  %856 = vmatprep.mubr.bf16.mxu0 %v976_v4  ;;  %v972_v5 = vld [vmem:[%s1217_s2 + $0x20] sm:$0xff]   ;;  %v974_v7 = vld [vmem:[%s1217_s2 + $0x30] sm:$0xff]   ;;  %v975_v8 = vld [vmem:[%s1217_s2 + $0x38] sm:$0xff]  }
   0x4   :  { %842 = vmatprep.subr.bf16.mxu0 %v969_v1  ;;  %v977_v9 = vld [vmem:[%s1218_s1 + $0x8] sm:$0xff]   ;;  %v978_v10 = vld [vmem:[%s1218_s1 + $0x10] sm:$0xff]   ;;  %v979_v11 = vld [vmem:[%s1218_s1 + $0x18] sm:$0xff]  }
   0x5   :  { %v980_v12 = vld [vmem:[%s1218_s1 + $0x20] sm:$0xff]   ;;  %v981_v13 = vld [vmem:[%s1218_s1 + $0x28] sm:$0xff]   ;;  %v982_v14 = vld [vmem:[%s1218_s1 + $0x30] sm:$0xff]  }
   0x6   :  { %v983_v15 = vld [vmem:[%s1218_s1 + $0x38] sm:$0xff]   ;;  %v1086_v16 = vld [vmem:[%s1219_s0] sm:$0xff]   ;;  %v993_v18 = vld [vmem:[%s1220_s4 + $0x8] sm:$0xff]  }
   0x7   :  { %843 = vmatpush3.bf16.msra.mxu0 %v969_v1  ;;  %888 = vmatprep.mubr.bf16.mxu1 %v1086_v16  ;;  %v992_v17 = vld [vmem:[%s1220_s4] sm:$0xff]   ;;  %v994_v19 = vld [vmem:[%s1220_s4 + $0x10] sm:$0xff]   ;;  %v995_v20 = vld [vmem:[%s1220_s4 + $0x18] sm:$0xff]  }
   0x8   :  { %844 = vmatprep.subr.bf16.mxu0 %v970_v2  ;;  %v996_v21 = vld [vmem:[%s1220_s4 + $0x20] sm:$0xff]   ;;  %v997_v22 = vld [vmem:[%s1220_s4 + $0x28] sm:$0xff]   ;;  %v1115_v48 = vld [vmem:[%s1219_s0 + $0x10] sm:$0xff]  }
   0x9   :  { %v1110_v47 = vld [vmem:[%s1219_s0 + $0x8] sm:$0xff]   ;;  %v1122_v49 = vld [vmem:[%s1219_s0 + $0x18] sm:$0xff]   ;;  %v1127_v50 = vld [vmem:[%s1219_s0 + $0x20] sm:$0xff]  }
   0xa   :  { %v1134_v51 = vld [vmem:[%s1219_s0 + $0x28] sm:$0xff]   ;;  %v1139_v52 = vld [vmem:[%s1219_s0 + $0x30] sm:$0xff]   ;;  %v1146_v53 = vld [vmem:[%s1219_s0 + $0x38] sm:$0xff]  }
   0xb   :  { %845 = vmatpush3.bf16.msra.mxu0 %v970_v2  ;;  %v998_v54 = vld [vmem:[%s1220_s4 + $0x30] sm:$0xff]   ;;  %v999_v55 = vld [vmem:[%s1220_s4 + $0x38] sm:$0xff]   ;;  %v758_v56 = vld [vmem:[%s1221_s3] ss:$0 sm:$0xff] }
   0xc   :  { %846 = vmatprep.subr.bf16.mxu0 %v971_v3 }
   0xf   :  { %847 = vmatpush3.bf16.msra.mxu0 %v971_v3 }
  0x10   :  { %848 = vmatprep.subr.bf16.mxu0 %v972_v5 }
  0x13   :  { %849 = vmatpush3.bf16.msra.mxu0 %v972_v5 }
  0x14   :  { %850 = vmatprep.subr.bf16.mxu0 %v973_v6 }
  0x17   :  { %851 = vmatpush3.bf16.msra.mxu0 %v973_v6 }
  0x18   :  { %852 = vmatprep.subr.bf16.mxu0 %v974_v7 }
  0x1b   :  { %853 = vmatpush3.bf16.msra.mxu0 %v974_v7 }
  0x1c   :  { %854 = vmatprep.subr.bf16.mxu0 %v975_v8 }
  0x1f   :  { %855 = vmatpush3.bf16.msra.mxu0 %v975_v8 }
  0x20   :  { %904 = vmatprep.subr.bf16.mxu0 %v992_v17 }
  0x22   :  { %857 = vmatmul.mubr.bf16.vlgmr.msra.gmra.mrb[0].mxu0 %v977_v9 }
  0x23   :  { %860 = vmatprep.mubr.bf16.mxu0 %v978_v10  ;;  %905 = vmatpush3.bf16.msra.mxu0 %v992_v17 }
  0x24   :  { %906 = vmatprep.subr.bf16.mxu0 %v993_v18 }
  0x27   :  { %907 = vmatpush3.bf16.msra.mxu0 %v993_v18 }
  0x28   :  { %908 = vmatprep.subr.bf16.mxu0 %v994_v19 }
  0x2a   :  { %861 = vmatmul.mubr.bf16.gmra.mrb[4].mxu0 %v979_v11 }
  0x2b   :  { %864 = vmatprep.mubr.bf16.mxu0 %v980_v12  ;;  %909 = vmatpush3.bf16.msra.mxu0 %v994_v19 }
  0x2c   :  { %910 = vmatprep.subr.bf16.mxu0 %v995_v20 }
  0x2f   :  { %911 = vmatpush3.bf16.msra.mxu0 %v995_v20 }
  0x30   :  { %912 = vmatprep.subr.bf16.mxu0 %v996_v21 }
  0x32   :  { %865 = vmatmul.mubr.bf16.gmra.mrb[8].mxu0 %v981_v13 }
  0x33   :  { %868 = vmatprep.mubr.bf16.mxu0 %v982_v14  ;;  %913 = vmatpush3.bf16.msra.mxu0 %v996_v21 }
  0x34   :  { %914 = vmatprep.subr.bf16.mxu0 %v997_v22 }
  0x37   :  { %915 = vmatpush3.bf16.msra.mxu0 %v997_v22 }
  0x38   :  { %916 = vmatprep.subr.bf16.mxu0 %v998_v54 }
  0x3a   :  { %869 = vmatmul.mubr.bf16.gmra.mrb[12].mxu0 %v983_v15 }
  0x3b   :  { %917 = vmatpush3.bf16.msra.mxu0 %v998_v54 }
  0x3c   :  { %918 = vmatprep.subr.bf16.mxu0 %v999_v55 }
  0x3f   :  { %919 = vmatpush3.bf16.msra.mxu0 %v999_v55 }
  0xf5   :  { %v858_v23 = vpop.f32.mrb[0].mxu0 }
  0xf6   :  { %v186_v24 = vpop.f32.mrb[1].mxu0 }
  0xf7   :  { %v859_v25 = vpop.f32.mrb[2].mxu0 }
  0xf8   :  { %v266_v26 = vpack.c.bf16 %v859_v25, %v858_v23  ;;  %v189_v27 = vpop.f32.mrb[3].mxu0 }
  0xf9   :  { %v265_v28 = vpack.c.bf16 %v189_v27, %v186_v24 }
  0xfb   :  { %872 = vmatprep.subr.bf16.mxu1 %v265_v28 }
  0xfc   :  { %873 = vmatpush3.bf16.msra.mxu1 %v265_v28 }
  0xfd   :  { %v862_v29 = vpop.f32.mrb[4].mxu0  ;;  %874 = vmatprep.subr.bf16.mxu1 %v266_v26 }
  0xfe   :  { %v202_v30 = vpop.f32.mrb[5].mxu0 }
  0xff   :  { %v863_v31 = vpop.f32.mrb[6].mxu0 }
 0x100   :  { %v268_v32 = vpack.c.bf16 %v863_v31, %v862_v29  ;;  %v205_v33 = vpop.f32.mrb[7].mxu0  ;;  %875 = vmatpush3.bf16.msra.mxu1 %v266_v26 }
 0x101   :  { %v267_v34 = vpack.c.bf16 %v205_v33, %v202_v30 }
 0x103   :  { %876 = vmatprep.subr.bf16.mxu1 %v267_v34 }
 0x104   :  { %877 = vmatpush3.bf16.msra.mxu1 %v267_v34 }
 0x105   :  { %v866_v35 = vpop.f32.mrb[8].mxu0  ;;  %878 = vmatprep.subr.bf16.mxu1 %v268_v32 }
 0x106   :  { %v218_v36 = vpop.f32.mrb[9].mxu0 }
 0x107   :  { %v867_v37 = vpop.f32.mrb[10].mxu0 }
 0x108   :  { %v270_v38 = vpack.c.bf16 %v867_v37, %v866_v35  ;;  %v221_v39 = vpop.f32.mrb[11].mxu0  ;;  %879 = vmatpush3.bf16.msra.mxu1 %v268_v32 }
 0x109   :  { %v269_v40 = vpack.c.bf16 %v221_v39, %v218_v36 }
 0x10b   :  { %880 = vmatprep.subr.bf16.mxu1 %v269_v40 }
 0x10c   :  { %881 = vmatpush3.bf16.msra.mxu1 %v269_v40 }
 0x10d   :  { %v870_v41 = vpop.f32.mrb[12].mxu0  ;;  %882 = vmatprep.subr.bf16.mxu1 %v270_v38 }
 0x10e   :  { %v234_v42 = vpop.f32.mrb[13].mxu0 }
 0x10f   :  { %v871_v43 = vpop.f32.mrb[14].mxu0 }
 0x110   :  { %v272_v44 = vpack.c.bf16 %v871_v43, %v870_v41  ;;  %v237_v45 = vpop.f32.mrb[15].mxu0  ;;  %883 = vmatpush3.bf16.msra.mxu1 %v270_v38 }
 0x111   :  { %v271_v46 = vpack.c.bf16 %v237_v45, %v234_v42 }
 0x113   :  { %884 = vmatprep.subr.bf16.mxu1 %v271_v46 }
 0x114   :  { %885 = vmatpush3.bf16.msra.mxu1 %v271_v46 }
 0x115   :  { %886 = vmatprep.subr.bf16.mxu1 %v272_v44 }
 0x118   :  { %887 = vmatpush3.bf16.msra.mxu1 %v272_v44 }
 0x11b   :  { %889 = vmatmul.mubr.bf16.vlgmr.msra.gmra.mrb[0].mxu1 %v1110_v47 }
 0x11c   :  { %892 = vmatprep.mubr.bf16.mxu1 %v1115_v48 }
 0x123   :  { %893 = vmatmul.mubr.bf16.gmra.mrb[4].mxu1 %v1122_v49 }
 0x124   :  { %896 = vmatprep.mubr.bf16.mxu1 %v1127_v50 }
 0x12b   :  { %897 = vmatmul.mubr.bf16.gmra.mrb[8].mxu1 %v1134_v51 }
 0x12c   :  { %900 = vmatprep.mubr.bf16.mxu1 %v1139_v52 }
 0x133   :  { %901 = vmatmul.mubr.bf16.gmra.mrb[12].mxu1 %v1146_v53 }
 0x134   :  { %952 = vmatprep.mubr.bf16.mxu1 %v1086_v16 }
 0x1ee   :  { %v890_v57 = vpop.f32.mrb[0].mxu1 }
 0x1ef   :  { %v371_v58 = vadd.f32 %v890_v57, %v758_v56  ;;  %v362_v59 = vpop.f32.mrb[1].mxu1 }
 0x1f0   :  { %v363_v60 = vadd.f32 %v758_v56, %v362_v59  ;;  %v891_v61 = vpop.f32.mrb[2].mxu1 }
 0x1f1   :  { %v374_v62 = vadd.f32 %v891_v61, %v758_v56  ;;  %v365_v63 = vpop.f32.mrb[3].mxu1  ;;  %v427_v1 = vmax.f32 %v371_v58, 0.0 }
 0x1f2   :  { %v366_v0 = vadd.f32 %v758_v56, %v365_v63  ;;  %v425_v3 = vmax.f32 %v363_v60, 0.0 }
 0x1f3   :  { %v428_v2 = vmax.f32 %v374_v62, 0.0 }
 0x1f4   :  { %v426_v4 = vmax.f32 %v366_v0, 0.0 }
 0x1f5   :  { %v442_v5 = vpack.c.bf16 %v428_v2, %v427_v1 }
 0x1f6   :  { %v441_v6 = vpack.c.bf16 %v426_v4, %v425_v3  ;;  %v894_v7 = vpop.f32.mrb[4].mxu1 }
 0x1f7   :  { %v387_v8 = vadd.f32 %v894_v7, %v758_v56  ;;  %v378_v9 = vpop.f32.mrb[5].mxu1 }
 0x1f8   :  { %v379_v10 = vadd.f32 %v758_v56, %v378_v9  ;;  %v895_v11 = vpop.f32.mrb[6].mxu1  ;;  %920 = vmatprep.mubr.bf16.mxu0 %v441_v6 }
 0x1f9   :  { %v390_v12 = vadd.f32 %v895_v11, %v758_v56  ;;  %v381_v13 = vpop.f32.mrb[7].mxu1  ;;  %921 = vmatmul.mubr.bf16.vlgmr.msra.gmra.mrb[16].mxu0 %v442_v5  ;;  %v431_v15 = vmax.f32 %v387_v8, 0.0 }
 0x1fa   :  { %v382_v14 = vadd.f32 %v758_v56, %v381_v13  ;;  %v429_v17 = vmax.f32 %v379_v10, 0.0 }
 0x1fb   :  { %v432_v16 = vmax.f32 %v390_v12, 0.0 }
 0x1fc   :  { %v430_v18 = vmax.f32 %v382_v14, 0.0 }
 0x1fd   :  { %v444_v19 = vpack.c.bf16 %v432_v16, %v431_v15  ;;  %v775_v16 = vld [vmem:[%s1222_s5] ss:$0 sm:$0xff] }
 0x1fe   :  { %v443_v20 = vpack.c.bf16 %v430_v18, %v429_v17  ;;  %v898_v21 = vpop.f32.mrb[8].mxu1 }
 0x1ff   :  { %v403_v22 = vadd.f32 %v898_v21, %v758_v56  ;;  %v394_v23 = vpop.f32.mrb[9].mxu1 }
 0x200   :  { %v395_v24 = vadd.f32 %v758_v56, %v394_v23  ;;  %v899_v25 = vpop.f32.mrb[10].mxu1  ;;  %924 = vmatprep.mubr.bf16.mxu0 %v443_v20 }
 0x201   :  { %v406_v26 = vadd.f32 %v899_v25, %v758_v56  ;;  %v397_v27 = vpop.f32.mrb[11].mxu1  ;;  %925 = vmatmul.mubr.bf16.gmra.mrb[20].mxu0 %v444_v19  ;;  %v435_v29 = vmax.f32 %v403_v22, 0.0 }
 0x202   :  { %v398_v28 = vadd.f32 %v758_v56, %v397_v27  ;;  %v433_v31 = vmax.f32 %v395_v24, 0.0 }
 0x203   :  { %v436_v30 = vmax.f32 %v406_v26, 0.0 }
 0x204   :  { %v434_v32 = vmax.f32 %v398_v28, 0.0 }
 0x205   :  { %v446_v33 = vpack.c.bf16 %v436_v30, %v435_v29 }
 0x206   :  { %v445_v34 = vpack.c.bf16 %v434_v32, %v433_v31  ;;  %v902_v35 = vpop.f32.mrb[12].mxu1 }
 0x207   :  { %v419_v36 = vadd.f32 %v902_v35, %v758_v56  ;;  %v410_v37 = vpop.f32.mrb[13].mxu1 }
 0x208   :  { %v411_v38 = vadd.f32 %v758_v56, %v410_v37  ;;  %v903_v39 = vpop.f32.mrb[14].mxu1  ;;  %928 = vmatprep.mubr.bf16.mxu0 %v445_v34 }
 0x209   :  { %v422_v40 = vadd.f32 %v903_v39, %v758_v56  ;;  %v413_v41 = vpop.f32.mrb[15].mxu1  ;;  %929 = vmatmul.mubr.bf16.gmra.mrb[24].mxu0 %v446_v33  ;;  %v439_v43 = vmax.f32 %v419_v36, 0.0 }
 0x20a   :  { %v414_v42 = vadd.f32 %v758_v56, %v413_v41  ;;  %v437_v45 = vmax.f32 %v411_v38, 0.0 }
 0x20b   :  { %v440_v44 = vmax.f32 %v422_v40, 0.0 }
 0x20c   :  { %v438_v46 = vmax.f32 %v414_v42, 0.0 }
 0x20d   :  { %v448_v54 = vpack.c.bf16 %v440_v44, %v439_v43 }
 0x20e   :  { %v447_v55 = vpack.c.bf16 %v438_v46, %v437_v45 }
 0x210   :  { %932 = vmatprep.mubr.bf16.mxu0 %v447_v55 }
 0x211   :  { %933 = vmatmul.mubr.bf16.gmra.mrb[28].mxu0 %v448_v54 }
 0x2cc   :  { %v922_v57 = vpop.f32.mrb[16].mxu0 }
 0x2cd   :  { %v547_v58 = vpop.f32.mrb[17].mxu0 }
 0x2ce   :  { %v923_v59 = vpop.f32.mrb[18].mxu0 }
 0x2cf   :  { %v611_v60 = vpack.c.bf16 %v923_v59, %v922_v57  ;;  %v550_v61 = vpop.f32.mrb[19].mxu0 }
 0x2d0   :  { %v610_v62 = vpack.c.bf16 %v550_v61, %v547_v58 }
 0x2d2   :  { %936 = vmatprep.subr.bf16.mxu1 %v610_v62 }
 0x2d3   :  { %937 = vmatpush3.bf16.msra.mxu1 %v610_v62 }
 0x2d4   :  { %v926_v63 = vpop.f32.mrb[20].mxu0  ;;  %938 = vmatprep.subr.bf16.mxu1 %v611_v60 }
 0x2d5   :  { %v563_v0 = vpop.f32.mrb[21].mxu0 }
 0x2d6   :  { %v927_v56 = vpop.f32.mrb[22].mxu0 }
 0x2d7   :  { %v613_v1 = vpack.c.bf16 %v927_v56, %v926_v63  ;;  %v566_v2 = vpop.f32.mrb[23].mxu0  ;;  %939 = vmatpush3.bf16.msra.mxu1 %v611_v60 }
 0x2d8   :  { %v612_v3 = vpack.c.bf16 %v566_v2, %v563_v0 }
 0x2da   :  { %940 = vmatprep.subr.bf16.mxu1 %v612_v3 }
 0x2db   :  { %941 = vmatpush3.bf16.msra.mxu1 %v612_v3 }
 0x2dc   :  { %v930_v4 = vpop.f32.mrb[24].mxu0  ;;  %942 = vmatprep.subr.bf16.mxu1 %v613_v1 }
 0x2dd   :  { %v579_v5 = vpop.f32.mrb[25].mxu0 }
 0x2de   :  { %v931_v6 = vpop.f32.mrb[26].mxu0 }
 0x2df   :  { %v615_v7 = vpack.c.bf16 %v931_v6, %v930_v4  ;;  %v582_v8 = vpop.f32.mrb[27].mxu0  ;;  %943 = vmatpush3.bf16.msra.mxu1 %v613_v1 }
 0x2e0   :  { %v614_v9 = vpack.c.bf16 %v582_v8, %v579_v5 }
 0x2e2   :  { %944 = vmatprep.subr.bf16.mxu1 %v614_v9 }
 0x2e3   :  { %945 = vmatpush3.bf16.msra.mxu1 %v614_v9 }
 0x2e4   :  { %v934_v10 = vpop.f32.mrb[28].mxu0  ;;  %946 = vmatprep.subr.bf16.mxu1 %v615_v7 }
 0x2e5   :  { %v595_v11 = vpop.f32.mrb[29].mxu0 }
 0x2e6   :  { %v935_v12 = vpop.f32.mrb[30].mxu0 }
 0x2e7   :  { %v617_v13 = vpack.c.bf16 %v935_v12, %v934_v10  ;;  %v598_v14 = vpop.f32.mrb[31].mxu0  ;;  %947 = vmatpush3.bf16.msra.mxu1 %v615_v7 }
 0x2e8   :  { %v616_v15 = vpack.c.bf16 %v598_v14, %v595_v11 }
 0x2ea   :  { %948 = vmatprep.subr.bf16.mxu1 %v616_v15 }
 0x2eb   :  { %949 = vmatpush3.bf16.msra.mxu1 %v616_v15 }
 0x2ec   :  { %950 = vmatprep.subr.bf16.mxu1 %v617_v13 }
 0x2ef   :  { %951 = vmatpush3.bf16.msra.mxu1 %v617_v13 }
 0x2f2   :  { %953 = vmatmul.mubr.bf16.vlgmr.msra.gmra.mrb[16].mxu1 %v1110_v47 }
 0x2f3   :  { %956 = vmatprep.mubr.bf16.mxu1 %v1115_v48 }
 0x2fa   :  { %957 = vmatmul.mubr.bf16.gmra.mrb[20].mxu1 %v1122_v49 }
 0x2fb   :  { %960 = vmatprep.mubr.bf16.mxu1 %v1127_v50 }
 0x302   :  { %961 = vmatmul.mubr.bf16.gmra.mrb[24].mxu1 %v1134_v51 }
 0x303   :  { %964 = vmatprep.mubr.bf16.mxu1 %v1139_v52 }
 0x30a   :  { %965 = vmatmul.mubr.bf16.gmra.mrb[28].mxu1 %v1146_v53 }
 0x3c5   :  { %v954_v17 = vpop.f32.mrb[16].mxu1 }
 0x3c6   :  { %v668_v18 = vadd.f32 %v954_v17, %v775_v16  ;;  %v659_v19 = vpop.f32.mrb[17].mxu1 }
 0x3c7   :  { %v660_v47 = vadd.f32 %v775_v16, %v659_v19  ;;  %v955_v20 = vpop.f32.mrb[18].mxu1 }
 0x3c8   :  { %724 = vst [vmem:[%s1223_s6 + $0x10] sm:$0xff] %v668_v18  ;;  %v671_v48 = vadd.f32 %v955_v20, %v775_v16  ;;  %v662_v49 = vpop.f32.mrb[19].mxu1 }
 0x3c9   :  { %722 = vst [vmem:[%s1223_s6] sm:$0xff] %v660_v47  ;;  %v663_v50 = vadd.f32 %v775_v16, %v662_v49 }
 0x3ca   :  { %725 = vst [vmem:[%s1223_s6 + $0x18] sm:$0xff] %v671_v48 }
 0x3cb   :  { %723 = vst [vmem:[%s1223_s6 + $0x8] sm:$0xff] %v663_v50 }
 0x3cd   :  { %v958_v51 = vpop.f32.mrb[20].mxu1 }
 0x3ce   :  { %v684_v52 = vadd.f32 %v958_v51, %v775_v16  ;;  %v675_v53 = vpop.f32.mrb[21].mxu1 }
 0x3cf   :  { %v676_v21 = vadd.f32 %v775_v16, %v675_v53  ;;  %v959_v22 = vpop.f32.mrb[22].mxu1 }
 0x3d0   :  { %728 = vst [vmem:[%s1223_s6 + $0x30] sm:$0xff] %v684_v52  ;;  %v687_v23 = vadd.f32 %v959_v22, %v775_v16  ;;  %v678_v24 = vpop.f32.mrb[23].mxu1 }
 0x3d1   :  { %726 = vst [vmem:[%s1223_s6 + $0x20] sm:$0xff] %v676_v21  ;;  %v679_v25 = vadd.f32 %v775_v16, %v678_v24 }
 0x3d2   :  { %729 = vst [vmem:[%s1223_s6 + $0x38] sm:$0xff] %v687_v23 }
 0x3d3   :  { %727 = vst [vmem:[%s1223_s6 + $0x28] sm:$0xff] %v679_v25 }
 0x3d5   :  { %v962_v26 = vpop.f32.mrb[24].mxu1 }
 0x3d6   :  { %v700_v27 = vadd.f32 %v962_v26, %v775_v16  ;;  %v691_v28 = vpop.f32.mrb[25].mxu1 }
 0x3d7   :  { %v692_v29 = vadd.f32 %v775_v16, %v691_v28  ;;  %v963_v30 = vpop.f32.mrb[26].mxu1 }
 0x3d8   :  { %732 = vst [vmem:[%s1223_s6 + $0x50] sm:$0xff] %v700_v27  ;;  %v703_v31 = vadd.f32 %v963_v30, %v775_v16  ;;  %v694_v32 = vpop.f32.mrb[27].mxu1 }
 0x3d9   :  { %730 = vst [vmem:[%s1223_s6 + $0x40] sm:$0xff] %v692_v29  ;;  %v695_v33 = vadd.f32 %v775_v16, %v694_v32 }
 0x3da   :  { %733 = vst [vmem:[%s1223_s6 + $0x58] sm:$0xff] %v703_v31 }
 0x3db   :  { %731 = vst [vmem:[%s1223_s6 + $0x48] sm:$0xff] %v695_v33 }
 0x3dd   :  { %v966_v34 = vpop.f32.mrb[28].mxu1 }
 0x3de   :  { %v716_v35 = vadd.f32 %v966_v34, %v775_v16  ;;  %v707_v36 = vpop.f32.mrb[29].mxu1 }
 0x3df   :  { %v708_v37 = vadd.f32 %v775_v16, %v707_v36  ;;  %v967_v38 = vpop.f32.mrb[30].mxu1 }
 0x3e0   :  { %736 = vst [vmem:[%s1223_s6 + $0x70] sm:$0xff] %v716_v35  ;;  %v719_v39 = vadd.f32 %v967_v38, %v775_v16  ;;  %v710_v40 = vpop.f32.mrb[31].mxu1 }
 0x3e1   :  { %734 = vst [vmem:[%s1223_s6 + $0x60] sm:$0xff] %v708_v37  ;;  %v711_v41 = vadd.f32 %v775_v16, %v710_v40 }
 0x3e2   :  { %737 = vst [vmem:[%s1223_s6 + $0x78] sm:$0xff] %v719_v39 }
 0x3e3   :  { %735 = vst [vmem:[%s1223_s6 + $0x68] sm:$0xff] %v711_v41 }

</bundles_post_ra>
